<compile_context>
chip_gen: v7x
topology: tpu7x:2x2x1
jax: 0.10.0
libtpu: 0.0.40
codegen_flags: <defaults>
</compile_context>

<pallas_src>
import jax
import jax.numpy as jnp
from jax.experimental import pallas as pl
from jax.experimental.pallas import tpu as pltpu


# ---------------------------------------------------------------------------
# Kernels
# ---------------------------------------------------------------------------
def _addmm_single_kernel(inp_ref, a_ref, b_ref, o_ref):
    # Whole K in one block: one MXU pass + one VPU add, no branches, no scratch.
    o_ref[...] = (
        inp_ref[...].astype(jnp.float32)
        + jnp.dot(a_ref[...], b_ref[...], preferred_element_type=jnp.float32)
    ).astype(o_ref.dtype)


def _addmm_kernel_acc_out(inp_ref, a_ref, b_ref, o_ref):
    # f32 output: accumulate directly into the output tile (resident across k,
    # since its block index is constant over the reduction axis).
    @pl.when(pl.program_id(2) == 0)
    def _():
        o_ref[...] = inp_ref[...].astype(jnp.float32)

    o_ref[...] += jnp.dot(a_ref[...], b_ref[...], preferred_element_type=jnp.float32)


def _addmm_kernel_acc_scratch(inp_ref, a_ref, b_ref, o_ref, acc_ref):
    # Sub-f32 output: f32 scratch accumulator; bias folded into the k==0 init.
    @pl.when(pl.program_id(2) == 0)
    def _():
        acc_ref[...] = inp_ref[...].astype(jnp.float32)

    acc_ref[...] += jnp.dot(a_ref[...], b_ref[...], preferred_element_type=jnp.float32)

    @pl.when(pl.program_id(2) == pl.num_programs(2) - 1)
    def _():
        o_ref[...] = acc_ref[...].astype(o_ref.dtype)


# ---------------------------------------------------------------------------
# Wrapper helpers
# ---------------------------------------------------------------------------
def _round_up(x, m):
    return ((x + m - 1) // m) * m


def _choose_tile(dim, pref, align):
    """Tile size: the preferred (256-multiple) tile if the dim is big enough,
    otherwise the whole (alignment-padded) dim."""
    if dim >= pref:
        return pref
    return _round_up(dim, align)


def _pad2d(x, rows, cols):
    pr, pc = rows - x.shape[0], cols - x.shape[1]
    if pr == 0 and pc == 0:
        return x
    return jnp.pad(x, ((0, pr), (0, pc)))


# ---------------------------------------------------------------------------
# Wrapper
# ---------------------------------------------------------------------------
def addmm_pallas(inp, mat1, mat2, *, cast_operands_to_bf16=True,
                 tm_pref=512, tn_pref=512, tk_pref=1024):
    """out = inp + mat1 @ mat2  (torch.addmm with beta = alpha = 1)."""
    M, K = mat1.shape
    K2, N = mat2.shape
    assert K == K2, f"inner dims mismatch: {K} vs {K2}"
    assert inp.shape == (M, N), f"bias shape {inp.shape} != {(M, N)}"

    out_dtype = inp.dtype

    # bf16 operands keep the MXU in its native mode (f32 accumulation preserved
    # via preferred_element_type) and halve mat1/mat2 HBM traffic.
    if cast_operands_to_bf16 and jnp.dtype(mat1.dtype) == jnp.float32:
        mat1 = mat1.astype(jnp.bfloat16)
    if cast_operands_to_bf16 and jnp.dtype(mat2.dtype) == jnp.float32:
        mat2 = mat2.astype(jnp.bfloat16)

    op_item = jnp.dtype(mat1.dtype).itemsize
    bias_item = jnp.dtype(inp.dtype).itemsize
    out_item = jnp.dtype(out_dtype).itemsize

    # Sub-32-bit data packs along sublanes: keep tm a multiple of the packed
    # sublane count so mat1 loads / narrow output stores stay unmasked.
    min_item = min(op_item, out_item)
    tm_align = {4: 8, 2: 16, 1: 32}.get(min_item, 8)

    tm = _choose_tile(M, tm_pref, tm_align)   # sublane axis
    tn = _choose_tile(N, tn_pref, 128)        # lane axis
    tk = _choose_tile(K, tk_pref, 128)        # reduction axis

    # v7x: both TensorCores are fed via the "parallel" grid axes; avoid a 1x1
    # parallel grid on medium shapes so the second core gets work.
    if (M + tm - 1) // tm == 1 and (N + tn - 1) // tn == 1 and M >= 256:
        tm = _round_up((M + 1) // 2, tm_align)

    Mp, Np, Kp = _round_up(M, tm), _round_up(N, tn), _round_up(K, tk)
    mt, nt, kt = Mp // tm, Np // tn, Kp // tk

    # Zero-pad to exact tile multiples (K padded with zeros keeps the reduction
    # exact); padded output rows/cols are sliced off below.
    inp_p = _pad2d(inp, Mp, Np)
    mat1_p = _pad2d(mat1, Mp, Kp)
    mat2_p = _pad2d(mat2, Kp, Np)

    out_shape = jax.ShapeDtypeStruct((Mp, Np), out_dtype)

    # Advisory cost: actual streamed traffic (mat1 re-read nt times, mat2 mt times).
    cost = pl.CostEstimate(
        flops=2 * Mp * Np * Kp,
        transcendentals=0,
        bytes_accessed=(Mp * Kp * op_item * nt
                        + Kp * Np * op_item * mt
                        + Mp * Np * (bias_item + out_item)),
    )

    # Explicit scoped-VMEM limit sized from the double-buffered footprint
    # (safe on v5e 16 MiB / v6e 32 MiB defaults and v7x's 64 MiB physical).
    use_scratch = kt > 1 and jnp.dtype(out_dtype) != jnp.dtype(jnp.float32)
    footprint = 2 * (tm * tn * bias_item + tm * tk * op_item
                     + tk * tn * op_item + tm * tn * out_item)
    if use_scratch:
        footprint += tm * tn * 4
    vmem_limit = int(min(64 * 1024 * 1024,
                         max(32 * 1024 * 1024, footprint * 3 // 2)))

    if kt == 1:
        # Degenerate reduction: drop the K grid axis entirely.
        out_p = pl.pallas_call(
            _addmm_single_kernel,
            out_shape=out_shape,
            grid_spec=pltpu.PrefetchScalarGridSpec(
                num_scalar_prefetch=0,
                grid=(mt, nt),
                in_specs=[
                    pl.BlockSpec((tm, tn), lambda i, j: (i, j)),   # bias
                    pl.BlockSpec((tm, Kp), lambda i, j: (i, 0)),   # mat1
                    pl.BlockSpec((Kp, tn), lambda i, j: (0, j)),   # mat2
                ],
                out_specs=pl.BlockSpec((tm, tn), lambda i, j: (i, j)),
            ),
            compiler_params=pltpu.CompilerParams(
                dimension_semantics=("parallel", "parallel"),
                vmem_limit_bytes=vmem_limit,
            ),
            cost_estimate=cost,
            input_output_aliases={0: 0},   # donate bias buffer as output buffer
        )(inp_p, mat1_p, mat2_p)
    else:
        # General K-split path (K is the last, "arbitrary", grid axis).
        in_specs = [
            pl.BlockSpec((tm, tn), lambda i, j, k: (i, j)),  # bias (resident over k)
            pl.BlockSpec((tm, tk), lambda i, j, k: (i, k)),  # mat1
            pl.BlockSpec((tk, tn), lambda i, j, k: (k, j)),  # mat2
        ]
        out_specs = pl.BlockSpec((tm, tn), lambda i, j, k: (i, j))

        if use_scratch:
            kernel, scratch = _addmm_kernel_acc_scratch, [
                pltpu.VMEM((tm, tn), jnp.float32)
            ]
        else:
            kernel, scratch = _addmm_kernel_acc_out, []

        # TODO(synk): when K*N*op_item is only a few MiB, pin mat2 VMEM-resident
        # (full-extent BlockSpec, constant index_map) to drop its mt-fold re-stream.
        out_p = pl.pallas_call(
            kernel,
            out_shape=out_shape,
            grid_spec=pltpu.PrefetchScalarGridSpec(
                num_scalar_prefetch=0,
                grid=(mt, nt, kt),
                in_specs=in_specs,
                out_specs=out_specs,
                scratch_shapes=scratch,
            ),
            compiler_params=pltpu.CompilerParams(
                dimension_semantics=("parallel", "parallel", "arbitrary"),
                vmem_limit_bytes=vmem_limit,
            ),
            cost_estimate=cost,
            input_output_aliases={0: 0},
        )(inp_p, mat1_p, mat2_p)

    if (Mp, Np) != (M, N):
        out_p = out_p[:M, :N]
    return out_p


def model_forward(inp, mat1, mat2, dim=1):
    v1 = addmm_pallas(inp, mat1, mat2)
    # torch.cat([v1], dim) with a single operand is the identity.
    v2 = jnp.concatenate([v1], axis=dim)
    return v2


if __name__ == "__main__":
    key = jax.random.PRNGKey(0)
    k1, k2, k3 = jax.random.split(key, 3)

    # Small addmm-compatible shapes: input (M, N), mat1 (M, K), mat2 (K, N).
    M, K, N = 128, 256, 128
    inp = jax.random.normal(k1, (M, N), dtype=jnp.float32)
    m1 = jax.random.normal(k2, (M, K), dtype=jnp.float32)
    m2 = jax.random.normal(k3, (K, N), dtype=jnp.float32)

    fwd = jax.jit(model_forward, static_argnames=("dim",))

    out = jax.block_until_ready(fwd(inp, m1, m2, dim=1))
    ref = inp + jnp.dot(m1.astype(jnp.bfloat16), m2.astype(jnp.bfloat16),
                        preferred_element_type=jnp.float32)
    assert out.shape == (M, N)
    assert jnp.allclose(out, ref, atol=1e-2, rtol=1e-2)

    # Exercise the K-split + padding path (non-divisible dims, kt > 1).
    M2, K2, N2 = 200, 2176, 192
    k4, k5, k6 = jax.random.split(k3, 3)
    inp2 = jax.random.normal(k4, (M2, N2), dtype=jnp.float32)
    m1b = jax.random.normal(k5, (M2, K2), dtype=jnp.float32)
    m2b = jax.random.normal(k6, (K2, N2), dtype=jnp.float32)
    out2 = jax.block_until_ready(fwd(inp2, m1b, m2b, dim=1))
    ref2 = inp2 + jnp.dot(m1b.astype(jnp.bfloat16), m2b.astype(jnp.bfloat16),
                          preferred_element_type=jnp.float32)
    assert out2.shape == (M2, N2)
    assert jnp.allclose(out2, ref2, atol=5e-2, rtol=5e-2)

    # f32-operand fallback path (flag off) against a high-precision reference.
    out3 = jax.block_until_ready(
        jax.jit(lambda a, b, c: addmm_pallas(a, b, c, cast_operands_to_bf16=False))(
            inp, m1, m2))
    ref3 = inp + jax.lax.dot(m1, m2, precision=jax.lax.Precision.HIGHEST)
    assert jnp.allclose(out3, ref3, atol=2e-2, rtol=2e-3)

    print("KERNEL_OK")
</pallas_src>

<mosaic_0001>
module attributes {stable_mosaic.version = 11 : i64} {
  func.func @_addmm_single_kernel(%arg0: i32, %arg1: i32, %arg2: memref<128x128xf32, #tpu.memory_space<vmem>>, %arg3: memref<128x256xbf16, #tpu.memory_space<vmem>>, %arg4: memref<256x128xbf16, #tpu.memory_space<vmem>>, %arg5: memref<128x128xf32, #tpu.memory_space<vmem>>) attributes {dimension_semantics = [#tpu.dimension_semantics<parallel>, #tpu.dimension_semantics<parallel>], iteration_bounds = array<i64: 1, 1>, scalar_prefetch = 0 : i64, scratch_operands = 0 : i64, tpu.core_type = #tpu.core_type<tc>, window_params = [{transform_indices = @transform_0, window_bounds = array<i64: 128, 128>}, {transform_indices = @transform_1, window_bounds = array<i64: 128, 256>}, {transform_indices = @transform_2, window_bounds = array<i64: 256, 128>}, {transform_indices = @transform_3, window_bounds = array<i64: 128, 128>}]} {
    %c0 = arith.constant 0 : index
    %c0_0 = arith.constant 0 : index
    %0 = vector.load %arg2[%c0, %c0_0] : memref<128x128xf32, #tpu.memory_space<vmem>>, vector<128x128xf32>
    %c0_1 = arith.constant 0 : index
    %c0_2 = arith.constant 0 : index
    %1 = vector.load %arg3[%c0_1, %c0_2] : memref<128x256xbf16, #tpu.memory_space<vmem>>, vector<128x256xbf16>
    %c0_3 = arith.constant 0 : index
    %c0_4 = arith.constant 0 : index
    %2 = vector.load %arg4[%c0_3, %c0_4] : memref<256x128xbf16, #tpu.memory_space<vmem>>, vector<256x128xbf16>
    %cst = arith.constant dense<0.000000e+00> : vector<128x128xf32>
    %3 = tpu.matmul %1, %2, %cst {dimension_numbers = #tpu.dot_dimension_numbers<[1], [0], [0], [1], [0, 0, 1, 1], [], []>} : vector<128x256xbf16>, vector<256x128xbf16>, vector<128x128xf32> -> vector<128x128xf32>
    %4 = arith.addf %0, %3 : vector<128x128xf32>
    %c0_5 = arith.constant 0 : index
    %c0_6 = arith.constant 0 : index
    %5 = vector.load %arg5[%c0_5, %c0_6] : memref<128x128xf32, #tpu.memory_space<vmem>>, vector<128x128xf32>
    tpu.vector_store %arg5[%c0_5, %c0_6], %4 {strides = array<i32>} : memref<128x128xf32, #tpu.memory_space<vmem>>, vector<128x128xf32>,
    return
  }
  func.func @transform_0(%arg0: i32, %arg1: i32) -> (i32, i32) {
    %c0_i32 = arith.constant 0 : i32
    return %arg0, %arg1 : i32, i32
  }
  func.func @transform_1(%arg0: i32, %arg1: i32) -> (i32, i32) {
    %c0_i32 = arith.constant 0 : i32
    %c0_i32_0 = arith.constant 0 : i32
    return %arg0, %c0_i32 : i32, i32
  }
  func.func @transform_2(%arg0: i32, %arg1: i32) -> (i32, i32) {
    %c0_i32 = arith.constant 0 : i32
    %c0_i32_0 = arith.constant 0 : i32
    return %c0_i32, %arg1 : i32, i32
  }
  func.func @transform_3(%arg0: i32, %arg1: i32) -> (i32, i32) {
    %c0_i32 = arith.constant 0 : i32
    return %arg0, %arg1 : i32, i32
  }
}

</mosaic_0001>

<bundles_post_ra>
// kernel: model_forward.1
= control target key start
LH: loop header
LB: loop body
LE: loop exit
PB: predicated region body
PF: predicated region fallthrough
CT: control target
= control target key end

     0   :  { %8 = vsyncpa [#allocation3], 0  ;;  %s770_s0 = inlined_call_operand.hbm [shape: f32[128,128], index: 0, kind: input, shape index: {}, may-alias: {0,3}]   ;;  %s771_s1 = inlined_call_operand.vmem [shape: bf16[128,256], index: 1, kind: input, shape index: {}]   ;;  %s772_s2 = inlined_call_operand.vmem [shape: bf16[256,128], index: 2, kind: input, shape index: {}]   ;;  %s773_s3 = inlined_call_operand.hbm [shape: f32[128,128], index: 3, kind: output, shape index: {}, may-alias: {0,3}]  }
   0x1   :  { %9 = vsyncpa [#allocation4], 0  ;;  %s620_s12 = smov [#allocation2]   ;;  %s572_s16 = scalar_lea.hbm %s770_s0, 2048 }
   0x2   :  { %s15_s13 = sshll.u32 %s620_s12, 4  ;;  %p573_p0 = scmp.ne.s32.totalorder %s770_s0, %s572_s16  ;;  %s16_s13 = int_to_ptr.vmem [resolvable:$true] %s15_s13 }
   0x3   :  { %p576_p1 = scmp.lt.u32.totalorder %s572_s16, %s770_s0 }
   0x5   :  { %p578_p2 = pnand %p576_p1, %p573_p0 }
   0x7   :  { %581 = shalt.err (!%p578_p2)
}
   0x8   :  { %s582_s21 = scalar_lea.vmem %s16_s13, 2048  ;;  %p587_p4 = scmp.lt.s32.totalorder %s16_s13, %s16_s13 }
   0x9   :  { %p583_p3 = scmp.ne.s32.totalorder %s16_s13, %s582_s21  ;;  %p588_p5 = scmp.lt.s32.totalorder %s582_s21, %s582_s21 }
   0xb   :  { %p589_p6 = por %p588_p5, %p587_p4 }
   0xd   :  { %p590_p7 = pnand %p589_p6, %p583_p3 }
   0xf   :  { %593 = shalt.err (!%p590_p7)
}
  0x10   :  { %s621_s22 = smov 128   ;;  %s622_s23 = smov 8  }
  0x11   :  { %21 = dma.hbm_to_vmem [thread:$0]  %s770_s0, 2048, %s16_s13, [#allocation3], %s621_s22, %s621_s22, %s622_s23  }
  0x12   :  { %616 = dma.done.wait [#allocation3], 2048  }
  0x13   :  { %617 = vsyncadd [#allocation3], 4294965248  ;;  %v532_v0 = vld [vmem:[%s772_s2 + $0x40] sm:$0xff]   ;;  %v534_v2 = vld [vmem:[%s772_s2 + $0x48] sm:$0xff]  }
  0x14   :  { %v533_v1 = vld [vmem:[%s772_s2] sm:$0xff]   ;;  %448 = vmatprep.subr.bf16.mxu0 %v532_v0  ;;  %512 = vmatprep.subr.bf16.mxu1 %v532_v0  ;;  %v535_v3 = vld [vmem:[%s772_s2 + $0x8] sm:$0xff]   ;;  %v536_v4 = vld [vmem:[%s772_s2 + $0x50] sm:$0xff]  }
  0x15   :  { %449 = vmatpush3.bf16.msra.mxu0 %v533_v1  ;;  %520 = vmatpush3.bf16.msra.mxu1 %v533_v1  ;;  %v537_v5 = vld [vmem:[%s772_s2 + $0x10] sm:$0xff]   ;;  %v538_v6 = vld [vmem:[%s772_s2 + $0x58] sm:$0xff]   ;;  %v540_v8 = vld [vmem:[%s772_s2 + $0x60] sm:$0xff]  }
  0x16   :  { %450 = vmatprep.subr.bf16.mxu0 %v534_v2  ;;  %513 = vmatprep.subr.bf16.mxu1 %v534_v2  ;;  %v539_v7 = vld [vmem:[%s772_s2 + $0x18] sm:$0xff]   ;;  %v541_v9 = vld [vmem:[%s772_s2 + $0x20] sm:$0xff]   ;;  %v542_v10 = vld [vmem:[%s772_s2 + $0x68] sm:$0xff]  }
  0x17   :  { %v550_v11 = vld [vmem:[%s771_s1 + $0x4] ss:$8 sps:$4 sm:$0xff]   ;;  %v544_v14 = vld [vmem:[%s772_s2 + $0x70] sm:$0xff]   ;;  %v546_v16 = vld [vmem:[%s772_s2 + $0x78] sm:$0xff]  }
  0x18   :  { %v553_v12 = vld [vmem:[%s771_s1 + $0x44] ss:$8 sps:$4 sm:$0xff]   ;;  %302 = vmatprep.mubr.bf16.mxu0 %v550_v11  ;;  %v545_v15 = vld [vmem:[%s772_s2 + $0x30] sm:$0xff]   ;;  %v547_v17 = vld [vmem:[%s772_s2 + $0x38] sm:$0xff]  }
  0x19   :  { %451 = vmatpush3.bf16.msra.mxu0 %v535_v3  ;;  %521 = vmatpush3.bf16.msra.mxu1 %v535_v3  ;;  %v543_v13 = vld [vmem:[%s772_s2 + $0x28] sm:$0xff]   ;;  %v554_v20 = vld [vmem:[%s771_s1 + $0x14] ss:$8 sps:$4 sm:$0xff]   ;;  %v558_v22 = vld [vmem:[%s771_s1 + $0x10] ss:$8 sps:$4 sm:$0xff]  }
  0x1a   :  { %452 = vmatprep.subr.bf16.mxu0 %v536_v4  ;;  %514 = vmatprep.subr.bf16.mxu1 %v536_v4  ;;  %v548_v18 = vld [vmem:[%s771_s1] ss:$8 sps:$4 sm:$0xff]   ;;  %v556_v21 = vld [vmem:[%s771_s1 + $0x54] ss:$8 sps:$4 sm:$0xff]   ;;  %v559_v23 = vld [vmem:[%s771_s1 + $0x50] ss:$8 sps:$4 sm:$0xff]  }
  0x1b   :  { %334 = vmatprep.mubr.bf16.mxu1 %v553_v12  ;;  %v551_v19 = vld [vmem:[%s771_s1 + $0x40] ss:$8 sps:$4 sm:$0xff]   ;;  %v560_v24 = vld [vmem:[%s771_s1 + $0x24] ss:$8 sps:$4 sm:$0xff]   ;;  %v566_v28 = vld [vmem:[%s771_s1 + $0x34] ss:$8 sps:$4 sm:$0xff]  }
  0x1c   :  { %v562_v25 = vld [vmem:[%s771_s1 + $0x64] ss:$8 sps:$4 sm:$0xff]   ;;  %v564_v26 = vld [vmem:[%s771_s1 + $0x20] ss:$8 sps:$4 sm:$0xff]   ;;  %v568_v29 = vld [vmem:[%s771_s1 + $0x74] ss:$8 sps:$4 sm:$0xff]  }
  0x1d   :  { %453 = vmatpush3.bf16.msra.mxu0 %v537_v5  ;;  %522 = vmatpush3.bf16.msra.mxu1 %v537_v5  ;;  %v565_v27 = vld [vmem:[%s771_s1 + $0x60] ss:$8 sps:$4 sm:$0xff]   ;;  %v570_v30 = vld [vmem:[%s771_s1 + $0x30] ss:$8 sps:$4 sm:$0xff]  }
  0x1e   :  { %454 = vmatprep.subr.bf16.mxu0 %v538_v6  ;;  %515 = vmatprep.subr.bf16.mxu1 %v538_v6  ;;  %v571_v31 = vld [vmem:[%s771_s1 + $0x70] ss:$8 sps:$4 sm:$0xff]   ;;  %v30_v34 = vld [vmem:[#allocation2] sm:$0xff]  ;;  %v31_v42 = vld [vmem:[#allocation2 + $0x8] sm:$0xff]  ;;  %s623_s1 = smov [#allocation5]  }
  0x1f   :  { %v38_v36 = vld [vmem:[#allocation2 + $0x40] sm:$0xff]  ;;  %v39_v44 = vld [vmem:[#allocation2 + $0x48] sm:$0xff]  ;;  %v32_v54 = vld [vmem:[#allocation2 + $0x10] sm:$0xff]  ;;  %s404_s9 = sshll.u32 %s623_s1, 4  ;;  %s405_s9 = int_to_ptr.vmem [resolvable:$true] %s404_s9 }
  0x20   :  { %v40_v56 = vld [vmem:[#allocation2 + $0x50] sm:$0xff]  ;;  %v33_v62 = vld [vmem:[#allocation2 + $0x18] sm:$0xff]  ;;  %v42_v12 = vld [vmem:[#allocation2 + $0x60] sm:$0xff]  ;;  %s594_s10 = scalar_lea.vmem %s405_s9, 2048  ;;  %p599_p9 = scmp.lt.s32.totalorder %s405_s9, %s405_s9 }
  0x21   :  { %455 = vmatpush3.bf16.msra.mxu0 %v539_v7  ;;  %523 = vmatpush3.bf16.msra.mxu1 %v539_v7  ;;  %v41_v0 = vld [vmem:[#allocation2 + $0x58] sm:$0xff]  ;;  %p595_p8 = scmp.ne.s32.totalorder %s405_s9, %s594_s10  ;;  %p600_p10 = scmp.lt.s32.totalorder %s594_s10, %s594_s10 }
  0x22   :  { %456 = vmatprep.subr.bf16.mxu0 %v540_v8  ;;  %516 = vmatprep.subr.bf16.mxu1 %v540_v8 }
  0x23   :  { %p601_p11 = por %p600_p10, %p599_p9 }
  0x25   :  { %457 = vmatpush3.bf16.msra.mxu0 %v541_v9  ;;  %524 = vmatpush3.bf16.msra.mxu1 %v541_v9  ;;  %p602_p12 = pnand %p601_p11, %p595_p8 }
  0x26   :  { %458 = vmatprep.subr.bf16.mxu0 %v542_v10  ;;  %517 = vmatprep.subr.bf16.mxu1 %v542_v10  ;;  %v34_v10 = vld [vmem:[#allocation2 + $0x20] sm:$0xff] }
  0x29   :  { %459 = vmatpush3.bf16.msra.mxu0 %v543_v13  ;;  %525 = vmatpush3.bf16.msra.mxu1 %v543_v13 }
  0x2a   :  { %460 = vmatprep.subr.bf16.mxu0 %v544_v14  ;;  %518 = vmatprep.subr.bf16.mxu1 %v544_v14 }
  0x2d   :  { %461 = vmatpush3.bf16.msra.mxu0 %v545_v15  ;;  %526 = vmatpush3.bf16.msra.mxu1 %v545_v15 }
  0x2e   :  { %462 = vmatprep.subr.bf16.mxu0 %v546_v16  ;;  %519 = vmatprep.subr.bf16.mxu1 %v546_v16 }
  0x31   :  { %463 = vmatpush3.bf16.msra.mxu0 %v547_v17  ;;  %527 = vmatpush3.bf16.msra.mxu1 %v547_v17 }
  0x34   :  { %303 = vmatmul.mubr.bf16.vlgmr.msra.gmra.mrb[0].mxu0 %v548_v18  ;;  %335 = vmatmul.mubr.bf16.vlgmr.msra.gmra.mrb[0].mxu1 %v551_v19  ;;  %v35_v18 = vld [vmem:[#allocation2 + $0x28] sm:$0xff] }
  0x35   :  { %310 = vmatprep.mubr.bf16.mxu0 %v554_v20  ;;  %342 = vmatprep.mubr.bf16.mxu1 %v556_v21  ;;  %v43_v20 = vld [vmem:[#allocation2 + $0x68] sm:$0xff] }
  0x3c   :  { %311 = vmatmul.mubr.bf16.gmra.mrb[4].mxu0 %v558_v22  ;;  %343 = vmatmul.mubr.bf16.gmra.mrb[4].mxu1 %v559_v23 }
  0x3d   :  { %318 = vmatprep.mubr.bf16.mxu0 %v560_v24  ;;  %350 = vmatprep.mubr.bf16.mxu1 %v562_v25 }
  0x44   :  { %319 = vmatmul.mubr.bf16.gmra.mrb[8].mxu0 %v564_v26  ;;  %351 = vmatmul.mubr.bf16.gmra.mrb[8].mxu1 %v565_v27 }
  0x45   :  { %326 = vmatprep.mubr.bf16.mxu0 %v566_v28  ;;  %358 = vmatprep.mubr.bf16.mxu1 %v568_v29 }
  0x4c   :  { %327 = vmatmul.mubr.bf16.gmra.mrb[12].mxu0 %v570_v30  ;;  %359 = vmatmul.mubr.bf16.gmra.mrb[12].mxu1 %v571_v31  ;;  %v36_v30 = vld [vmem:[#allocation2 + $0x30] sm:$0xff] }
 0x107   :  { %v464_v32 = vpop.f32.mrb[0].mxu0  ;;  %v488_v33 = vpop.f32.mrb[0].mxu1 }
 0x108   :  { %v465_v35 = vpop.f32.mrb[1].mxu0  ;;  %v489_v37 = vpop.f32.mrb[1].mxu1 }
 0x109   :  { %v466_v38 = vadd.f32 %v465_v35, %v464_v32  ;;  %v490_v39 = vadd.f32 %v489_v37, %v488_v33  ;;  %v467_v40 = vpop.f32.mrb[2].mxu0  ;;  %v491_v41 = vpop.f32.mrb[2].mxu1  ;;  %v44_v32 = vld [vmem:[#allocation2 + $0x70] sm:$0xff] }
 0x10a   :  { %v468_v43 = vpop.f32.mrb[3].mxu0  ;;  %v492_v45 = vpop.f32.mrb[3].mxu1 }
 0x10b   :  { %v367_v46 = vadd.f32 %v466_v38, %v30_v34  ;;  %v375_v47 = vadd.f32 %v490_v39, %v38_v36  ;;  %v469_v48 = vadd.f32 %v468_v43, %v467_v40  ;;  %v493_v49 = vadd.f32 %v492_v45, %v491_v41  ;;  %v37_v38 = vld [vmem:[#allocation2 + $0x38] sm:$0xff] }
 0x10c   :  { %v45_v40 = vld [vmem:[#allocation2 + $0x78] sm:$0xff] }
 0x10d   :  { %383 = vst [vmem:[#allocation5] sm:$0xff] %v367_v46  ;;  %391 = vst [vmem:[#allocation5 + $0x40] sm:$0xff] %v375_v47  ;;  %v368_v50 = vadd.f32 %v469_v48, %v31_v42  ;;  %v376_v51 = vadd.f32 %v493_v49, %v39_v44 }
 0x10f   :  { %384 = vst [vmem:[#allocation5 + $0x8] sm:$0xff] %v368_v50  ;;  %392 = vst [vmem:[#allocation5 + $0x48] sm:$0xff] %v376_v51  ;;  %v470_v52 = vpop.f32.mrb[4].mxu0  ;;  %v494_v53 = vpop.f32.mrb[4].mxu1 }
 0x110   :  { %v471_v55 = vpop.f32.mrb[5].mxu0  ;;  %v495_v57 = vpop.f32.mrb[5].mxu1 }
 0x111   :  { %v472_v58 = vadd.f32 %v471_v55, %v470_v52  ;;  %v496_v59 = vadd.f32 %v495_v57, %v494_v53  ;;  %v473_v60 = vpop.f32.mrb[6].mxu0  ;;  %v497_v61 = vpop.f32.mrb[6].mxu1 }
 0x112   :  { %v474_v63 = vpop.f32.mrb[7].mxu0  ;;  %v498_v1 = vpop.f32.mrb[7].mxu1 }
 0x113   :  { %v369_v2 = vadd.f32 %v472_v58, %v32_v54  ;;  %v377_v3 = vadd.f32 %v496_v59, %v40_v56  ;;  %v475_v4 = vadd.f32 %v474_v63, %v473_v60  ;;  %v499_v5 = vadd.f32 %v498_v1, %v497_v61 }
 0x115   :  { %385 = vst [vmem:[#allocation5 + $0x10] sm:$0xff] %v369_v2  ;;  %393 = vst [vmem:[#allocation5 + $0x50] sm:$0xff] %v377_v3  ;;  %v370_v6 = vadd.f32 %v475_v4, %v33_v62  ;;  %v378_v7 = vadd.f32 %v499_v5, %v41_v0 }
 0x117   :  { %386 = vst [vmem:[#allocation5 + $0x18] sm:$0xff] %v370_v6  ;;  %394 = vst [vmem:[#allocation5 + $0x58] sm:$0xff] %v378_v7  ;;  %v476_v8 = vpop.f32.mrb[8].mxu0  ;;  %v500_v9 = vpop.f32.mrb[8].mxu1 }
 0x118   :  { %v477_v11 = vpop.f32.mrb[9].mxu0  ;;  %v501_v13 = vpop.f32.mrb[9].mxu1 }
 0x119   :  { %v478_v14 = vadd.f32 %v477_v11, %v476_v8  ;;  %v502_v15 = vadd.f32 %v501_v13, %v500_v9  ;;  %v479_v16 = vpop.f32.mrb[10].mxu0  ;;  %v503_v17 = vpop.f32.mrb[10].mxu1 }
 0x11a   :  { %v480_v19 = vpop.f32.mrb[11].mxu0  ;;  %v504_v21 = vpop.f32.mrb[11].mxu1 }
 0x11b   :  { %v371_v22 = vadd.f32 %v478_v14, %v34_v10  ;;  %v379_v23 = vadd.f32 %v502_v15, %v42_v12  ;;  %v481_v24 = vadd.f32 %v480_v19, %v479_v16  ;;  %v505_v25 = vadd.f32 %v504_v21, %v503_v17 }
 0x11d   :  { %387 = vst [vmem:[#allocation5 + $0x20] sm:$0xff] %v371_v22  ;;  %395 = vst [vmem:[#allocation5 + $0x60] sm:$0xff] %v379_v23  ;;  %v372_v26 = vadd.f32 %v481_v24, %v35_v18  ;;  %v380_v27 = vadd.f32 %v505_v25, %v43_v20 }
 0x11f   :  { %388 = vst [vmem:[#allocation5 + $0x28] sm:$0xff] %v372_v26  ;;  %396 = vst [vmem:[#allocation5 + $0x68] sm:$0xff] %v380_v27  ;;  %v482_v28 = vpop.f32.mrb[12].mxu0  ;;  %v506_v29 = vpop.f32.mrb[12].mxu1 }
 0x120   :  { %v483_v31 = vpop.f32.mrb[13].mxu0  ;;  %v507_v33 = vpop.f32.mrb[13].mxu1 }
 0x121   :  { %v484_v34 = vadd.f32 %v483_v31, %v482_v28  ;;  %v508_v35 = vadd.f32 %v507_v33, %v506_v29  ;;  %v485_v36 = vpop.f32.mrb[14].mxu0  ;;  %v509_v37 = vpop.f32.mrb[14].mxu1 }
 0x122   :  { %v486_v39 = vpop.f32.mrb[15].mxu0  ;;  %v510_v41 = vpop.f32.mrb[15].mxu1 }
 0x123   :  { %v373_v42 = vadd.f32 %v484_v34, %v36_v30  ;;  %v381_v43 = vadd.f32 %v508_v35, %v44_v32  ;;  %v487_v44 = vadd.f32 %v486_v39, %v485_v36  ;;  %v511_v45 = vadd.f32 %v510_v41, %v509_v37 }
 0x125   :  { %389 = vst [vmem:[#allocation5 + $0x30] sm:$0xff] %v373_v42  ;;  %397 = vst [vmem:[#allocation5 + $0x70] sm:$0xff] %v381_v43  ;;  %v374_v46 = vadd.f32 %v487_v44, %v37_v38  ;;  %v382_v47 = vadd.f32 %v511_v45, %v45_v40 }
 0x127   :  { %390 = vst [vmem:[#allocation5 + $0x38] sm:$0xff] %v374_v46  ;;  %398 = vst [vmem:[#allocation5 + $0x78] sm:$0xff] %v382_v47 }
 0x128   :  { %605 = shalt.err (!%p602_p12)
}
 0x129   :  { %s606_s13 = scalar_lea.hbm %s773_s3, 2048 }
 0x12a   :  { %p607_p13 = scmp.ne.s32.totalorder %s773_s3, %s606_s13  ;;  %p610_p0 = scmp.lt.u32.totalorder %s606_s13, %s773_s3 }
 0x12c   :  { %p612_p1 = pnand %p610_p0, %p607_p13 }
 0x12e   :  { %615 = shalt.err (!%p612_p1)
}
 0x12f   :  { %410 = dma.vmem_to_hbm [thread:$0]  %s405_s9, 2048, %s773_s3, [#allocation4], %s621_s22, %s621_s22, %s622_s23  }
 0x130   :  { %618 = dma.done.wait [#allocation4], 2048  }
 0x131   :  { %619 = vsyncadd [#allocation4], 4294965248 }
 0x132   :  { %414 = vsyncpa [#allocation3], 1 }
 0x133   :  { %415 = vsyncpa [#allocation4], 1 }

</bundles_post_ra>
